<compile_context>
chip_gen: v7x
topology: tpu7x:2x2x1
jax: 0.10.0
libtpu: 0.0.40
codegen_flags: <defaults>
</compile_context>

<pallas_src>
import functools

import numpy as np

import jax
import jax.numpy as jnp
from jax.experimental import pallas as pl
from jax.experimental.pallas import tpu as pltpu

_MiB = 1024 * 1024


def _round_up(x: int, m: int) -> int:
    return ((x + m - 1) // m) * m


def _cdiv(a: int, b: int) -> int:
    return (a + b - 1) // b


# ------------- bilinear interpolation operator (host-side, cached) ----------
def _interp_matrix_np(out_size: int, in_size: int) -> np.ndarray:
    """(out_size, in_size) row-stochastic matrix realizing PyTorch's 1-D linear
    interpolation with align_corners=False."""
    i = np.arange(out_size, dtype=np.float64)
    src = (i + 0.5) * (in_size / out_size) - 0.5
    src = np.maximum(src, 0.0)                       # PyTorch clamps negative coords
    i0 = np.minimum(np.floor(src).astype(np.int64), in_size - 1)
    i1 = np.minimum(i0 + 1, in_size - 1)
    frac = src - i0
    rows = np.arange(out_size)
    A = np.zeros((out_size, in_size), np.float64)
    A[rows, i0] += 1.0 - frac
    A[rows, i1] += frac
    return A.astype(np.float32)


@functools.lru_cache(maxsize=None)
def _kron_operator_bf16(H: int, W: int, Ho: int, Wo: int):
    """Resident interpolation operator kron(Ah, Aw)^T in bf16, cached per size."""
    Ah = _interp_matrix_np(Ho, H)                    # (Ho, H)
    Aw = _interp_matrix_np(Wo, W)                    # (Wo, W)
    kT = np.kron(Ah, Aw).T                           # (H*W, Ho*Wo); only ~4/(H*W) dense
    return jnp.asarray(kT, dtype=jnp.bfloat16)


# --------------------------- cached pallas_call builder ---------------------
@functools.lru_cache(maxsize=None)
def _build_resize_mae_call(M, HW, HoWo, TM, num_blocks, out_dtype_name,
                           loss_lanes, vmem_limit_bytes):
    out_dtype = jnp.dtype(out_dtype_name)

    def kernel(kT_ref, x_ref, lbl_ref, recon_ref, loss_ref):
        m = pl.program_id(0)
        # bf16 operands on the MXU, f32 accumulation.
        x16 = x_ref[...].astype(jnp.bfloat16)
        r = jnp.dot(x16, kT_ref[...], preferred_element_type=jnp.float32)
        recon_ref[...] = r.astype(recon_ref.dtype)

        # Mask ragged tail rows of the last block (their input rows are
        # undefined; their recon rows are dropped by Pallas on store).
        valid = M - m * TM
        rows = jax.lax.broadcasted_iota(jnp.int32, (TM, 1), 0)
        diff = jnp.abs(r - lbl_ref[...].astype(jnp.float32))
        diff = jnp.where(rows < valid, diff, 0.0)

        if loss_lanes == 128:
            # Lane-dense partial sum: fold lane-tiles with full-height vreg adds,
            # then one sublane reduce -> (1, 128) per block.
            acc = diff[:, 0:128]
            for j in range(1, HoWo // 128):
                acc = acc + diff[:, j * 128:(j + 1) * 128]
            loss_ref[...] = jnp.sum(acc, axis=0, keepdims=True).reshape(1, 1, 128)
        else:
            loss_ref[...] = jnp.sum(diff).reshape(1, 1, 1)

    cost = pl.CostEstimate(
        flops=int(2 * M * HoWo * HW),
        transcendentals=0,
        bytes_accessed=int(M * (4 * HW + 8 * HoWo) + 2 * HW * HoWo),
    )

    return pl.pallas_call(
        kernel,
        out_shape=(
            jax.ShapeDtypeStruct((M, HoWo), out_dtype),
            jax.ShapeDtypeStruct((num_blocks, 1, loss_lanes), jnp.float32),
        ),
        grid_spec=pltpu.PrefetchScalarGridSpec(
            num_scalar_prefetch=0,
            grid=(num_blocks,),
            in_specs=[
                # Grid-invariant operator: constant block index -> DMA'd once,
                # stays resident across the whole grid.
                pl.BlockSpec((HW, HoWo), lambda m: (0, 0)),
                pl.BlockSpec((TM, HW), lambda m: (m, 0)),      # input images
                pl.BlockSpec((TM, HoWo), lambda m: (m, 0)),    # labels
            ],
            out_specs=[
                pl.BlockSpec((TM, HoWo), lambda m: (m, 0)),            # recon (lane-dense)
                pl.BlockSpec((1, 1, loss_lanes), lambda m: (m, 0, 0)),  # MAE partials
            ],
        ),
        compiler_params=pltpu.CompilerParams(
            dimension_semantics=("parallel",),   # independent blocks -> megacore-friendly
            vmem_limit_bytes=int(vmem_limit_bytes),
        ),
        cost_estimate=cost,
    )


# --------------------------------- wrapper -----------------------------------
def dummy_bilinear_vsr(frames, labels, training=True, tile_m=512):
    B, N, C, H, W = (int(s) for s in frames.shape)
    Ho, Wo = int(labels.shape[-2]), int(labels.shape[-1])
    M, HW, HoWo = B * N * C, H * W, Ho * Wo

    # Row-major flattening is free (no HBM copy).
    x = frames.reshape(M, HW)
    lbl = labels.reshape(M, HoWo)
    kT = _kron_operator_bf16(H, W, Ho, Wo)           # (HW, HoWo) bf16, cached

    x_bytes = jnp.dtype(frames.dtype).itemsize
    lbl_bytes = jnp.dtype(labels.dtype).itemsize
    out_bytes = x_bytes
    kT_bytes = HW * HoWo * 2                          # bf16

    # ---- VMEM budget: derived from hardware, never the full physical VMEM ---
    try:
        vmem_cap = int(pltpu.get_tpu_info().vmem_capacity_bytes)
    except Exception:
        vmem_cap = 64 * _MiB                          # conservative (v7x-sized)
    budget = min((vmem_cap * 3) // 4, 96 * _MiB)

    def _block_bytes(tm):
        # Conservative: count double buffers for every streamed operand.
        return (2 * kT_bytes
                + 2 * tm * HW * x_bytes
                + 2 * tm * HoWo * lbl_bytes
                + 2 * tm * HoWo * out_bytes
                + 2 * 128 * 4)

    if 2 * kT_bytes + 8 * _MiB > budget:
        # TODO(synk): separable two-matmul resize (+ Ho*Wo-tiled grid axis) for
        # resolutions where the kron operator cannot fit in VMEM.
        raise ValueError("bilinear kron operator too large for VMEM at this size")

    # ---- block height: >=2 grid blocks when possible (v7x megacore), rows a
    #      multiple of 8, MXU-height multiples for large M, clamped to VMEM ----
    half = _cdiv(M, 2)
    if half >= 256:
        tm = _round_up(half, 256)
    elif half >= 128:
        tm = _round_up(half, 128)
    else:
        tm = _round_up(half, 8)
    TM = max(8, min(int(tile_m), tm))
    while TM > 8 and _block_bytes(TM) + 8 * _MiB > budget:
        TM = max(8, _round_up(TM // 2, 8))
    num_blocks = _cdiv(M, TM)

    loss_lanes = 128 if HoWo % 128 == 0 else 1
    vmem_limit = int(min(budget, max(32 * _MiB, _block_bytes(TM) + 8 * _MiB)))

    call = _build_resize_mae_call(M, HW, HoWo, TM, num_blocks,
                                  jnp.dtype(frames.dtype).name,
                                  loss_lanes, vmem_limit)
    recon_flat, loss_partials = call(kT, x, lbl)

    reconstruction = recon_flat.reshape(B, N, C, Ho, Wo)
    loss = {}
    if training:
        loss["MAE"] = jnp.sum(loss_partials) / jnp.float32(M * HoWo)
    return reconstruction, loss


if __name__ == "__main__":
    # TODO(synk): self.dummy = Conv2d(1,1,1) is never applied in the reference
    # forward pass, so its parameters are intentionally not materialized here.
    key = jax.random.PRNGKey(0)
    k_frames, k_labels = jax.random.split(key)
    B, N, C, H, W = 2, 3, 3, 16, 16
    Ho, Wo = 32, 32
    frames = jax.random.normal(k_frames, (B, N, C, H, W), jnp.float32)
    labels = jax.random.normal(k_labels, (B, N, C, Ho, Wo), jnp.float32)

    recon, loss = dummy_bilinear_vsr(frames, labels, training=True)
    recon = jax.block_until_ready(recon)
    mae = jax.block_until_ready(loss["MAE"])

    # Plain-JAX f32 separable reference of the same bilinear math.
    Ah = jnp.asarray(_interp_matrix_np(Ho, H))
    Aw = jnp.asarray(_interp_matrix_np(Wo, W))
    ref = jnp.einsum("oh,bnchw,pw->bncop", Ah, frames, Aw)
    ref_mae = jnp.mean(jnp.abs(ref - labels))

    assert recon.shape == (B, N, C, Ho, Wo)
    # bf16 MXU operands -> ~1e-3 relative error budget on the reconstruction.
    assert jnp.allclose(recon, ref, atol=2e-2, rtol=1e-2)
    assert jnp.allclose(mae, ref_mae, atol=5e-3, rtol=5e-3)

    print("KERNEL_OK")
</pallas_src>

<mosaic_0001>
module attributes {stable_mosaic.version = 11 : i64} {
  func.func @kernel(%arg0: i32, %arg1: memref<256x1024xbf16, #tpu.memory_space<vmem>>, %arg2: memref<16x256xf32, #tpu.memory_space<vmem>>, %arg3: memref<16x1024xf32, #tpu.memory_space<vmem>>, %arg4: memref<16x1024xf32, #tpu.memory_space<vmem>>, %arg5: memref<1x1x128xf32, #tpu.memory_space<vmem>>) attributes {dimension_semantics = [#tpu.dimension_semantics<parallel>], iteration_bounds = array<i64: 2>, scalar_prefetch = 0 : i64, scratch_operands = 0 : i64, tpu.core_type = #tpu.core_type<tc>, window_params = [{pipeline_mode = #tpu.pipeline_mode<synchronous>, transform_indices = @transform_0, window_bounds = array<i64: 256, 1024>}, {transform_indices = @transform_1, window_bounds = array<i64: 16, 256>}, {transform_indices = @transform_2, window_bounds = array<i64: 16, 1024>}, {transform_indices = @transform_3, window_bounds = array<i64: 16, 1024>}, {transform_indices = @transform_4, window_bounds = array<i64: 1, 1, 128>}]} {
    %c0 = arith.constant 0 : index
    %c0_0 = arith.constant 0 : index
    %0 = vector.load %arg2[%c0, %c0_0] : memref<16x256xf32, #tpu.memory_space<vmem>>, vector<16x256xf32>
    %1 = arith.truncf %0 : vector<16x256xf32> to vector<16x256xbf16>
    %c0_1 = arith.constant 0 : index
    %c0_2 = arith.constant 0 : index
    %2 = vector.load %arg1[%c0_1, %c0_2] : memref<256x1024xbf16, #tpu.memory_space<vmem>>, vector<256x1024xbf16>
    %cst = arith.constant dense<0.000000e+00> : vector<16x1024xf32>
    %3 = tpu.matmul %1, %2, %cst {dimension_numbers = #tpu.dot_dimension_numbers<[1], [0], [0], [1], [0, 0, 1, 1], [], []>} : vector<16x256xbf16>, vector<256x1024xbf16>, vector<16x1024xf32> -> vector<16x1024xf32>
    %c0_3 = arith.constant 0 : index
    %c0_4 = arith.constant 0 : index
    %4 = vector.load %arg4[%c0_3, %c0_4] : memref<16x1024xf32, #tpu.memory_space<vmem>>, vector<16x1024xf32>
    tpu.vector_store %arg4[%c0_3, %c0_4], %3 {strides = array<i32>} : memref<16x1024xf32, #tpu.memory_space<vmem>>, vector<16x1024xf32>,
    %c16_i32 = arith.constant 16 : i32
    %5 = arith.muli %arg0, %c16_i32 : i32
    %c18_i32 = arith.constant 18 : i32
    %6 = arith.subi %c18_i32, %5 : i32
    %7 = tpu.iota {dimensions = array<i32: 0>} : vector<16x1xi32>
    %c0_5 = arith.constant 0 : index
    %c0_6 = arith.constant 0 : index
    %8 = vector.load %arg3[%c0_5, %c0_6] : memref<16x1024xf32, #tpu.memory_space<vmem>>, vector<16x1024xf32>
    %9 = arith.subf %3, %8 : vector<16x1024xf32>
    %10 = math.absf %9 : vector<16x1024xf32>
    %11 = vector.broadcast %6 : i32 to vector<16x1xi32>
    %12 = arith.cmpi slt, %7, %11 : vector<16x1xi32>
    %cst_7 = arith.constant 0.000000e+00 : f32
    %13 = vector.shape_cast %12 : vector<16x1xi1> to vector<16x1xi1>
    %14 = vector.broadcast %13 : vector<16x1xi1> to vector<16x1024xi1>
    %15 = vector.broadcast %cst_7 : f32 to vector<16x1024xf32>
    %16 = arith.select %14, %10, %15 : vector<16x1024xi1>, vector<16x1024xf32>
    %17 = vector.extract_strided_slice %16 {offsets = [0, 0], sizes = [16, 128], strides = [1, 1]} : vector<16x1024xf32> to vector<16x128xf32>
    %18 = vector.extract_strided_slice %16 {offsets = [0, 128], sizes = [16, 128], strides = [1, 1]} : vector<16x1024xf32> to vector<16x128xf32>
    %19 = arith.addf %17, %18 : vector<16x128xf32>
    %20 = vector.extract_strided_slice %16 {offsets = [0, 256], sizes = [16, 128], strides = [1, 1]} : vector<16x1024xf32> to vector<16x128xf32>
    %21 = arith.addf %19, %20 : vector<16x128xf32>
    %22 = vector.extract_strided_slice %16 {offsets = [0, 384], sizes = [16, 128], strides = [1, 1]} : vector<16x1024xf32> to vector<16x128xf32>
    %23 = arith.addf %21, %22 : vector<16x128xf32>
    %24 = vector.extract_strided_slice %16 {offsets = [0, 512], sizes = [16, 128], strides = [1, 1]} : vector<16x1024xf32> to vector<16x128xf32>
    %25 = arith.addf %23, %24 : vector<16x128xf32>
    %26 = vector.extract_strided_slice %16 {offsets = [0, 640], sizes = [16, 128], strides = [1, 1]} : vector<16x1024xf32> to vector<16x128xf32>
    %27 = arith.addf %25, %26 : vector<16x128xf32>
    %28 = vector.extract_strided_slice %16 {offsets = [0, 768], sizes = [16, 128], strides = [1, 1]} : vector<16x1024xf32> to vector<16x128xf32>
    %29 = arith.addf %27, %28 : vector<16x128xf32>
    %30 = vector.extract_strided_slice %16 {offsets = [0, 896], sizes = [16, 128], strides = [1, 1]} : vector<16x1024xf32> to vector<16x128xf32>
    %31 = arith.addf %29, %30 : vector<16x128xf32>
    %cst_8 = arith.constant dense<0.000000e+00> : vector<128xf32>
    %32 = vector.multi_reduction <add>, %31, %cst_8 [0] : vector<16x128xf32> to vector<128xf32>
    %33 = vector.shape_cast %32 : vector<128xf32> to vector<1x128xf32>
    %34 = vector.shape_cast %33 : vector<1x128xf32> to vector<1x1x128xf32>
    %c0_9 = arith.constant 0 : index
    %c0_10 = arith.constant 0 : index
    %c0_11 = arith.constant 0 : index
    %35 = vector.load %arg5[%c0_9, %c0_10, %c0_11] : memref<1x1x128xf32, #tpu.memory_space<vmem>>, vector<1x1x128xf32>
    tpu.vector_store %arg5[%c0_9, %c0_10, %c0_11], %34 {strides = array<i32>} : memref<1x1x128xf32, #tpu.memory_space<vmem>>, vector<1x1x128xf32>,
    return
  }
  func.func @transform_0(%arg0: i32) -> (i32, i32) {
    %c0_i32 = arith.constant 0 : i32
    %c0_i32_0 = arith.constant 0 : i32
    %c0_i32_1 = arith.constant 0 : i32
    return %c0_i32, %c0_i32_0 : i32, i32
  }
  func.func @transform_1(%arg0: i32) -> (i32, i32) {
    %c0_i32 = arith.constant 0 : i32
    %c0_i32_0 = arith.constant 0 : i32
    return %arg0, %c0_i32 : i32, i32
  }
  func.func @transform_2(%arg0: i32) -> (i32, i32) {
    %c0_i32 = arith.constant 0 : i32
    %c0_i32_0 = arith.constant 0 : i32
    return %arg0, %c0_i32 : i32, i32
  }
  func.func @transform_3(%arg0: i32) -> (i32, i32) {
    %c0_i32 = arith.constant 0 : i32
    %c0_i32_0 = arith.constant 0 : i32
    return %arg0, %c0_i32 : i32, i32
  }
  func.func @transform_4(%arg0: i32) -> (i32, i32, i32) {
    %c0_i32 = arith.constant 0 : i32
    %c0_i32_0 = arith.constant 0 : i32
    %c0_i32_1 = arith.constant 0 : i32
    return %arg0, %c0_i32, %c0_i32_0 : i32, i32, i32
  }
}

</mosaic_0001>

<bundles_post_ra>
// kernel: tpu_custom_call.1
= control target key start
LH: loop header
LB: loop body
LE: loop exit
PB: predicated region body
PF: predicated region fallthrough
CT: control target
= control target key end

     0   :  { %10 = vsyncpa [#allocation3], 0  ;;  %s2400_s0 = inlined_call_operand.hbm [shape: bf16[256,1024], index: 0, kind: input, shape index: {}]   ;;  %s2401_s1 = inlined_call_operand.hbm [shape: f32[18,256], index: 1, kind: input, shape index: {}]   ;;  %s2402_s2 = inlined_call_operand.hbm [shape: f32[18,1024], index: 2, kind: input, shape index: {}]   ;;  %s2403_s3 = inlined_call_operand.hbm [shape: f32[18,1024], index: 3, kind: output, shape index: {0}]   ;;  %s2404_s4 = inlined_call_operand.hbm [shape: f32[2,1,128], index: 4, kind: output, shape index: {1}]  }
   0x1   :  { %11 = vsyncpa [#allocation6], 0 }
   0x2   :  { %13 = vsyncpa [#allocation6 + $0x1], 0 }
   0x3   :  { %14 = vsyncpa [#allocation4], 0 }
   0x4   :  { %16 = vsyncpa [#allocation4 + $0x1], 0 }
   0x5   :  { %17 = vsyncpa [#allocation10], 0 }
   0x6   :  { %19 = vsyncpa [#allocation10 + $0x1], 0  ;;  %s2011_s15 = smov 0   ;;  %s2013_s16 = smov 0  }
   0x7   :  { %s2015_s17 = smov 0   ;;  %s2017_s18 = smov 0  }
   0x8 LB: > { %s2032_s19 = sadd.s32 4294967295, %s1971_s18   ;;  %s1544_s20 = sadd.s32 4294967294, %s1971_s18   ;;  %s1971_s18 = sphi %s2017_s18, %s2431_s18   ;;  %s1967_s17 = sphi %s2015_s17, %s2430_s17   ;;  %s1963_s16 = sphi %s2013_s16, %s2429_s16   ;;  %s1959_s15 = sphi %s2011_s15, %s2428_s15  }
   0x9   : > { %s2036_s21 = sadd.s32 1, %s1971_s18   ;;  %s53_s22 = sadd.s32 1, %s1967_s17 }
   0xa   : > { %s50_s23 = ssub.s32 %s1971_s18, %s2036_s21  ;;  %p60_p0 = scmp.ne.s32.totalorder %s1967_s17, %s1963_s16 }
   0xb   : > { %p51_p1 = scmp.eq.s32.totalorder %s50_s23, 0  ;;  %p61_p2 = scmp.eq.s32.totalorder %s1971_s18, 0 }
   0xc   : > { %p66_p3 = scmp.ne.s32.totalorder %s1963_s16, %s1959_s15  ;;  %p2405_p4 = scmp.eq.s32.totalorder %s2032_s19, 0 }
   0xd   : > { %s2048_s24 = scalar_select %p51_p1, %s1967_s17, %s53_s22  }
   0xe   : > { %p2050_p5 = por %p61_p2, %p60_p0  ;;  %p2056_p6 = por %p2405_p4, %p66_p3 }
   0xf   : > { %p116_p7 = scmp.eq.s32.totalorder %s2032_s19, 1  ;;  %p122_p8 = scmp.eq.s32.totalorder %s1544_s20, 1 }
  0x10   : > { %s2409_s25 = scalar_select %p2050_p5, 1, 0 }
  0x11   : > { %s2410_s26 = scalar_select %p2056_p6, 1, 0 }
  0x12   : > { %p1545_p9 = scmp.ge.s32.totalorder %s1971_s18, 1  ;;  %p155_p10 = scmp.lt.s32.totalorder %s1971_s18, 3 }
  0x13   : > { %p2063_p11 = por %p116_p7, %p60_p0  ;;  %p2067_p12 = por %p122_p8, %p66_p3 }
  0x14   : > { %p2071_p13 = pnand %p1545_p9, %p155_p10  ;;  %s1973_s30 = smov [#allocation2]  }
  0x15   : > { %s2411_s27 = scalar_select %p2063_p11, 1, 0 }
  0x16   : > { %s2412_s28 = scalar_select %p2067_p12, 1, 0 }
  0x17   : > { %s2413_s29 = scalar_select %p2071_p13, 1, 0 }
  0x18   : > { %p1730_p1 = pneg %p2071_p13  ;;  %s167_s5 = sshll.u32 %s1973_s30, 4  ;;  %s168_s5 = int_to_ptr.vmem [resolvable:$true] %s167_s5 }
  0x19   : > { %s1785_s9 = scalar_lea.hbm %s2400_s0, 16384 }
  0x1a   : > { %p2079_p2 = pnand %p1730_p1, %p2405_p4  ;;  %p1786_p0 = scmp.ne.s32.totalorder %s2400_s0, %s1785_s9 }
  0x1b   : > { %p1792_p9 = scmp.lt.u32.totalorder %s1785_s9, %s2400_s0 }
  0x1c   : > { %p1787_p3 = pneg %p2079_p2 }
  0x1e   : > { %p1788_p7 = pnand %p1787_p3, %p1786_p0 }
  0x20   : > { %p1789_p8 = pneg %p1788_p7 }
  0x22   : > { %p1794_p10 = pnand %p1792_p9, %p1789_p8 }
  0x24   : > { %1797 = shalt.err (!%p1794_p10)
}
  0x25   : > { %s1798_s14 = scalar_lea.vmem %s168_s5, 16384  ;;  %p1806_p11 = scmp.lt.s32.totalorder %s168_s5, %s168_s5 }
  0x26   : > { %p1799_p1 = scmp.ne.s32.totalorder %s168_s5, %s1798_s14  ;;  %p1807_p6 = scmp.lt.s32.totalorder %s1798_s14, %s1798_s14 }
  0x28   : > { %p1801_p4 = pnand %p1799_p1, %p1787_p3  ;;  %p1808_p13 = por %p1807_p6, %p1806_p11 }
  0x2a   : > { %p1802_p12 = pneg %p1801_p4 }
  0x2c   : > { %p1809_p5 = pnand %p1808_p13, %p1802_p12 }
  0x2e   : > { %1812 = shalt.err (!%p1809_p5)
}
  0x2f   : > { %s1974_s20 = smov 512   ;;  %s1975_s22 = smov 32  }
  0x30   : > { %1733 = dma.hbm_to_vmem [thread:$0]  (!%p2079_p2), %s2400_s0, 16384, %s168_s5, [#allocation3], %s1974_s20, %s1974_s20, %s1975_s22  }
  0x31   : > { %p1547_p0 = scmp.ge.s32.totalorder %s1971_s18, 2 }
  0x32   : > { %p2415_p4 = scmp.ne.s32.totalorder (!%p1547_p0), %s2409_s25, 0 }
  0x33   : > { %177 = sbr.rel (%p1547_p0) target bundleno = 130 (0x82), region = 20 }
  0x3a   : > { %180 = sbr.rel (!%p2415_p4) target bundleno = 93 (0x5d), region = 24  ;;  %s181_s7 = sand.u32 (%p2415_p4), 1, %s1971_s18  }
  0x3b   : > { %s183_s8 = sand.u32 (%p2415_p4), 1, %s1967_s17   ;;  %s1549_s10 = sshll.u32 (%p2415_p4), %s1971_s18, 1 }
  0x3c   : > { %s1548_s9 = sshll.u32 (%p2415_p4), %s183_s8, 5  ;;  %s187_s6 = ssub.s32 (%p2415_p4), 3, %s1549_s10 }
  0x3d   : > { %p188_p5 = scmp.lt.s32.totalorder (%p2415_p4), %s187_s6, 2  ;;  %s2110_s12 = scalar_lea.sflag (%p2415_p4), [#allocation6], %s181_s7 }
  0x3e   : > { %s185_s13 = scalar_lea.vmem (%p2415_p4), [#allocation5], %s1548_s9 }
  0x41   : > { %s2433_s6 = smov (!%p188_p5, %s187_s6), 2 }
  0x42   : > { %s2107_s11 = sshll.u32 %s2433_s6, 8 }
  0x43   : > { %s193_s5 = ssub.s32 512, %s2107_s11 }
  0x44   : > { %194 = vsyncadd %s2110_s12, %s193_s5  ;;  %p1552_p6 = scmp.ne.s32.totalorder %s2107_s11, 0  ;;  %s1714_s14 = sshll.u32 %s1971_s18, 9 }
  0x45   : > { %s2118_s23 = scalar_lea.hbm %s2401_s1, %s1714_s14  ;;  %s200_s30 = sshll.u32 %s185_s13, 4  ;;  %s2120_s30 = int_to_ptr.vmem [resolvable:$true] %s200_s30 }
  0x46   : > { %s1813_s7 = scalar_lea.hbm %s2118_s23, %s2107_s11  ;;  %s1817_s10 = scalar_lea.hbm %s2401_s1, 768 }
  0x47   : > { %p1814_p11 = scmp.ne.s32.totalorder %s2118_s23, %s1813_s7  ;;  %p1818_p2 = scmp.lt.u32.totalorder %s2118_s23, %s2401_s1 }
  0x48   : > { %p1819_p3 = scmp.lt.u32.totalorder %s1817_s10, %s1813_s7  ;;  %p1821_p8 = scmp.lt.u32.totalorder %s1813_s7, %s2118_s23 }
  0x49   : > { %p1815_p12 = pnand %p1814_p11, %p1552_p6 }
  0x4a   : > { %p1820_p7 = por %p1819_p3, %p1818_p2 }
  0x4b   : > { %p1816_p13 = pneg %p1815_p12 }
  0x4c   : > { %p1822_p9 = por %p1821_p8, %p1820_p7 }
  0x4e   : > { %p1823_p10 = pnand %p1822_p9, %p1816_p13 }
  0x50   : > { %1826 = shalt.err (!%p1823_p10)
}
  0x51   : > { %s1827_s13 = scalar_lea.vmem %s2120_s30, %s2107_s11  ;;  %s1976_s14 = smov [#allocation5]  }
  0x52   : > { %p1828_p1 = scmp.ne.s32.totalorder %s2120_s30, %s1827_s13  ;;  %s1831_s20 = sshll.u32 %s1976_s14, 4  ;;  %s1832_s20 = int_to_ptr.vmem [resolvable:$false] %s1831_s20 }
  0x53   : > { %s1833_s22 = scalar_lea.vmem %s1832_s20, 1024  ;;  %p1834_p11 = scmp.lt.s32.totalorder %s2120_s30, %s1832_s20 }
  0x54   : > { %p1829_p4 = pnand %p1828_p1, %p1552_p6  ;;  %p1835_p12 = scmp.lt.s32.totalorder %s1833_s22, %s1827_s13 }
  0x56   : > { %p1830_p5 = pneg %p1829_p4  ;;  %p1836_p2 = por %p1835_p12, %p1834_p11 }
  0x58   : > { %p1837_p3 = pnand %p1836_p2, %p1830_p5 }
  0x5a   : > { %1840 = shalt.err (!%p1837_p3)
}
  0x5b   : > { %s1977_s7 = smov 256   ;;  %s1978_s8 = smov 16  }
  0x5c   : > { %206 = dma.hbm_to_vmem [thread:$0]  (%p1552_p6), %s2118_s23, %s2107_s11, %s2120_s30, %s2110_s12, %s1977_s7, %s1977_s7, %s1978_s8  }
  0x5d PF: > { %p2416_p13 = scmp.ne.s32.totalorder %s2409_s25, 0 }
  0x5e   : > { %s210_s9 = sand.u32 (%p2416_p13), 1, %s1971_s18   ;;  %s212_s10 = sand.u32 (%p2416_p13), 1, %s1967_s17  }
  0x5f   : > { %209 = sbr.rel (!%p2416_p13) target bundleno = 130 (0x82), region = 28  ;;  %s1557_s6 = sshll.u32 (%p2416_p13), %s212_s10, 7 }
  0x60   : > { %s1558_s5 = sshll.u32 (%p2416_p13), %s1971_s18, 1  ;;  %s2155_s22 = scalar_lea.sflag (%p2416_p13), [#allocation6], %s210_s9 }
  0x61   : > { %s216_s13 = ssub.s32 (%p2416_p13), 3, %s1558_s5  ;;  %s214_s11 = scalar_lea.vmem (%p2416_p13), [#allocation7], %s1557_s6 }
  0x62   : > { %p217_p7 = scmp.lt.s32.totalorder (%p2416_p13), %s216_s13, 2 }
  0x66   : > { %s2435_s13 = smov (!%p217_p7, %s216_s13), 2 }
  0x67   : > { %s2152_s14 = sshll.u32 %s2435_s13, 10 }
  0x68   : > { %s222_s20 = ssub.s32 2048, %s2152_s14 }
  0x69   : > { %223 = vsyncadd %s2155_s22, %s222_s20  ;;  %p1561_p6 = scmp.ne.s32.totalorder %s2152_s14, 0  ;;  %s1717_s25 = sshll.u32 %s1971_s18, 11 }
  0x6a   : > { %s2163_s30 = scalar_lea.hbm %s2402_s2, %s1717_s25  ;;  %s229_s7 = sshll.u32 %s214_s11, 4  ;;  %s2165_s7 = int_to_ptr.vmem [resolvable:$true] %s229_s7 }
  0x6b   : > { %s1841_s8 = scalar_lea.hbm %s2163_s30, %s2152_s14  ;;  %s1845_s6 = scalar_lea.hbm %s2402_s2, 3072 }
  0x6c   : > { %p1842_p8 = scmp.ne.s32.totalorder %s2163_s30, %s1841_s8  ;;  %p1846_p1 = scmp.lt.u32.totalorder %s2163_s30, %s2402_s2 }
  0x6d   : > { %p1847_p4 = scmp.lt.u32.totalorder %s1845_s6, %s1841_s8  ;;  %p1849_p11 = scmp.lt.u32.totalorder %s1841_s8, %s2163_s30 }
  0x6e   : > { %p1843_p9 = pnand %p1842_p8, %p1561_p6 }
  0x6f   : > { %p1848_p5 = por %p1847_p4, %p1846_p1 }
  0x70   : > { %p1844_p10 = pneg %p1843_p9 }
  0x71   : > { %p1850_p12 = por %p1849_p11, %p1848_p5 }
  0x73   : > { %p1851_p2 = pnand %p1850_p12, %p1844_p10 }
  0x75   : > { %1854 = shalt.err (!%p1851_p2)
}
  0x76   : > { %s1855_s20 = scalar_lea.vmem %s2165_s7, %s2152_s14  ;;  %s1979_s11 = smov [#allocation7]  }
  0x77   : > { %p1856_p3 = scmp.ne.s32.totalorder %s2165_s7, %s1855_s20  ;;  %s1859_s25 = sshll.u32 %s1979_s11, 4  ;;  %s1860_s25 = int_to_ptr.vmem [resolvable:$false] %s1859_s25 }
  0x78   : > { %s1861_s12 = scalar_lea.vmem %s1860_s25, 4096  ;;  %p1862_p8 = scmp.lt.s32.totalorder %s2165_s7, %s1860_s25 }
  0x79   : > { %p1857_p13 = pnand %p1856_p3, %p1561_p6  ;;  %p1863_p9 = scmp.lt.s32.totalorder %s1861_s12, %s1855_s20 }
  0x7b   : > { %p1858_p7 = pneg %p1857_p13  ;;  %p1864_p1 = por %p1863_p9, %p1862_p8 }
  0x7d   : > { %p1865_p4 = pnand %p1864_p1, %p1858_p7 }
  0x7f   : > { %1868 = shalt.err (!%p1865_p4)
}
  0x80   : > { %s1980_s23 = smov 1024   ;;  %s1981_s8 = smov 64  }
  0x81   : > { %235 = dma.hbm_to_vmem [thread:$0]  (%p1561_p6), %s2163_s30, %s2152_s14, %s2165_s7, %s2155_s22, %s1980_s23, %s1980_s23, %s1981_s8  }
  0x82 PF: > { %p2417_p10 = scmp.ne.s32.totalorder %s2413_s29, 0 }
  0x83   : > { %p2418_p5 = scmp.eq.s32.totalorder (!%p2417_p10), %s2032_s19, 0 }
  0x84   : > { %241 = sbr.rel (%p2417_p10) target bundleno = 571 (0x23b), region = 32 }
  0x8b   : > { %1942 = dma.done.wait (%p2418_p5), [#allocation3], 16384   ;;  %p2419_p11 = pmov %p2418_p5 }
  0x8c   : > { %s247_s9 = sand.u32 1, %s2032_s19   ;;  %s2200_s10 = sand.u32 1, %s1963_s16  }
  0x8d   : > { %1944 = vsyncadd (%p2419_p11), [#allocation3], 4294950912  ;;  %s1568_s6 = sshll.u32 %s2200_s10, 5  ;;  %s248_s14 = scalar_lea.sflag [#allocation6], %s247_s9 }
  0x8e   : > { %s2203_s22 = scalar_lea.vmem [#allocation5], %s1568_s6  ;;  %p2420_p6 = scmp.ne.s32.totalorder %s2410_s26, 0 }
  0x90   : > { %1946 = dma.done.wait (%p2420_p6), %s248_s14, 2560  }
  0x91   : > { %1948 = vsyncadd (%p2420_p6), %s248_s14, 4294964736  ;;  %v318_v0 = vld [vmem:[#allocation2] sm:$0xff]  ;;  %v319_v2 = vld [vmem:[#allocation2 + $0x8] sm:$0xff]  ;;  %s1569_s26 = sshll.u32 %s2200_s10, 7  ;;  %s1699_s29 = sshll.u32 %s2032_s19, 4 }
  0x92   : > { %v322_v1 = vld [vmem:[#allocation2 + $0x20] sm:$0xff]  ;;  %v323_v5 = vld [vmem:[#allocation2 + $0x28] sm:$0xff]  ;;  %v315_v54 = vld [vmem:[%s2203_s22 + $0x18] sm:$0xff]  ;;  %s1275_s30 = ssub.s32 18, %s1699_s29  ;;  %s2229_s7 = scalar_lea.vmem [#allocation7], %s1569_s26 }
  0x93   : > { %v1572_v3 = vcombine.high %v318_v0, %v322_v1  ;;  %v1571_v4 = vcombine.low %v318_v0, %v322_v1  ;;  %v326_v6 = vld [vmem:[#allocation2 + $0x40] sm:$0xff]  ;;  %v1574_v8 = vcombine.high %v319_v2, %v323_v5  ;;  %v1573_v9 = vcombine.low %v319_v2, %v323_v5  ;;  %v327_v11 = vld [vmem:[#allocation2 + $0x48] sm:$0xff]  ;;  %s2236_s5 = scalar_lea.vmem [#allocation8], %s1569_s26  ;;  %s293_s13 = scalar_lea.vmem [#allocation9], %s2200_s10 }
  0x94   : > { %v330_v7 = vld [vmem:[#allocation2 + $0x60] sm:$0xff]  ;;  %v331_v12 = vld [vmem:[#allocation2 + $0x68] sm:$0xff]  ;;  %s1373_s20 = scalar_lea.sflag [#allocation4], %s2200_s10  ;;  %s1378_s11 = scalar_lea.sflag [#allocation10], %s2200_s10 }
  0x95   : > { %v1580_v10 = vcombine.high %v326_v6, %v330_v7  ;;  %v334_v13 = vld [vmem:[#allocation2 + $0x80] sm:$0xff]  ;;  %1086 = vmatprep.subr.bf16.mxu0 %v1572_v3  ;;  %v1582_v14 = vcombine.high %v327_v11, %v331_v12  ;;  %v335_v16 = vld [vmem:[#allocation2 + $0x88] sm:$0xff]  ;;  %1129 = vmatprep.subr.bf16.mxu1 %v1574_v8  ;;  %v1579_v18 = vcombine.low %v326_v6, %v330_v7  ;;  %p2425_p12 = scmp.ne.s32.totalorder %s2411_s27, 0 }
  0x96   : > { %v338_v15 = vld [vmem:[#allocation2 + $0xa0] sm:$0xff]  ;;  %v339_v17 = vld [vmem:[#allocation2 + $0xa8] sm:$0xff]  ;;  %1087 = vmatpush1.bf16.msra.mxu0 %v1571_v4  ;;  %1130 = vmatpush1.bf16.msra.mxu1 %v1573_v9  ;;  %v1581_v19 = vcombine.low %v327_v11, %v331_v12  ;;  %s1701_s25 = sshll.u32 (%p2425_p12), %s2032_s19, 1 }
  0x97   : > { %1088 = vmatprep.subr.bf16.mxu0 %v1580_v10  ;;  %v1588_v20 = vcombine.high %v334_v13, %v338_v15  ;;  %1131 = vmatprep.subr.bf16.mxu1 %v1582_v14  ;;  %v1590_v21 = vcombine.high %v335_v16, %v339_v17  ;;  %v342_v22 = vld [vmem:[#allocation2 + $0xc0] sm:$0xff]  ;;  %v343_v24 = vld [vmem:[#allocation2 + $0xc8] sm:$0xff]  ;;  %v1587_v26 = vcombine.low %v334_v13, %v338_v15  ;;  %s1385_s12 = ssub.s32 (%p2425_p12), 3, %s1701_s25 }
  0x98   : > { %v346_v23 = vld [vmem:[#allocation2 + $0xe0] sm:$0xff]  ;;  %v347_v25 = vld [vmem:[#allocation2 + $0xe8] sm:$0xff]  ;;  %v1589_v27 = vcombine.low %v335_v16, %v339_v17  ;;  %p1386_p2 = scmp.lt.s32.totalorder (%p2425_p12), %s1385_s12, 2 }
  0x99   : > { %v1596_v28 = vcombine.high %v342_v22, %v346_v23  ;;  %v1598_v29 = vcombine.high %v343_v24, %v347_v25  ;;  %v350_v30 = vld [vmem:[#allocation2 + $0x100] sm:$0xff]  ;;  %v351_v32 = vld [vmem:[#allocation2 + $0x108] sm:$0xff]  ;;  %v1595_v34 = vcombine.low %v342_v22, %v346_v23  ;;  %v1597_v35 = vcombine.low %v343_v24, %v347_v25 }
  0x9a   : > { %1089 = vmatpush1.bf16.msra.mxu0 %v1579_v18  ;;  %1132 = vmatpush1.bf16.msra.mxu1 %v1581_v19  ;;  %v354_v31 = vld [vmem:[#allocation2 + $0x120] sm:$0xff]  ;;  %v355_v33 = vld [vmem:[#allocation2 + $0x128] sm:$0xff] }
  0x9b   : > { %1090 = vmatprep.subr.bf16.mxu0 %v1588_v20  ;;  %1133 = vmatprep.subr.bf16.mxu1 %v1590_v21  ;;  %v1604_v36 = vcombine.high %v350_v30, %v354_v31  ;;  %v1606_v37 = vcombine.high %v351_v32, %v355_v33  ;;  %v358_v38 = vld [vmem:[#allocation2 + $0x140] sm:$0xff]  ;;  %v359_v40 = vld [vmem:[#allocation2 + $0x148] sm:$0xff]  ;;  %v1603_v42 = vcombine.low %v350_v30, %v354_v31 }
  0x9c   : > { %v362_v39 = vld [vmem:[#allocation2 + $0x160] sm:$0xff]  ;;  %v363_v41 = vld [vmem:[#allocation2 + $0x168] sm:$0xff]  ;;  %v1605_v43 = vcombine.low %v351_v32, %v355_v33 }
  0x9d   : > { %v1612_v44 = vcombine.high %v358_v38, %v362_v39  ;;  %v1614_v45 = vcombine.high %v359_v40, %v363_v41  ;;  %v366_v46 = vld [vmem:[#allocation2 + $0x180] sm:$0xff]  ;;  %v367_v48 = vld [vmem:[#allocation2 + $0x188] sm:$0xff]  ;;  %v1611_v50 = vcombine.low %v358_v38, %v362_v39  ;;  %v1613_v51 = vcombine.low %v359_v40, %v363_v41 }
  0x9e   : > { %1091 = vmatpush1.bf16.msra.mxu0 %v1587_v26  ;;  %1134 = vmatpush1.bf16.msra.mxu1 %v1589_v27  ;;  %v370_v47 = vld [vmem:[#allocation2 + $0x1a0] sm:$0xff]  ;;  %v371_v49 = vld [vmem:[#allocation2 + $0x1a8] sm:$0xff] }
  0x9f   : > { %1092 = vmatprep.subr.bf16.mxu0 %v1596_v28  ;;  %1135 = vmatprep.subr.bf16.mxu1 %v1598_v29  ;;  %v1620_v52 = vcombine.high %v366_v46, %v370_v47  ;;  %v313_v53 = vld [vmem:[%s2203_s22 + $0x8] sm:$0xff]  ;;  %v1622_v55 = vcombine.high %v367_v48, %v371_v49  ;;  %v374_v56 = vld [vmem:[#allocation2 + $0x1c0] sm:$0xff]  ;;  %v1619_v61 = vcombine.low %v366_v46, %v370_v47 }
  0xa0   : > { %v378_v57 = vld [vmem:[#allocation2 + $0x1e0] sm:$0xff]  ;;  %v2211_v58 = vpack.c.bf16 %v315_v54, %v313_v53  ;;  %v375_v59 = vld [vmem:[#allocation2 + $0x1c8] sm:$0xff]  ;;  %v1621_v62 = vcombine.low %v367_v48, %v371_v49 }
  0xa1   : > { %v379_v60 = vld [vmem:[#allocation2 + $0x1e8] sm:$0xff]  ;;  %v1628_v63 = vcombine.high %v374_v56, %v378_v57  ;;  %v382_v1 = vld [vmem:[#allocation2 + $0x200] sm:$0xff]  ;;  %v1627_v5 = vcombine.low %v374_v56, %v378_v57 }
  0xa2   : > { %1093 = vmatpush1.bf16.msra.mxu0 %v1595_v34  ;;  %1136 = vmatpush1.bf16.msra.mxu1 %v1597_v35  ;;  %v1630_v0 = vcombine.high %v375_v59, %v379_v60  ;;  %v386_v2 = vld [vmem:[#allocation2 + $0x220] sm:$0xff]  ;;  %v383_v3 = vld [vmem:[#allocation2 + $0x208] sm:$0xff]  ;;  %v1629_v6 = vcombine.low %v375_v59, %v379_v60 }
  0xa3   : > { %1094 = vmatprep.subr.bf16.mxu0 %v1604_v36  ;;  %1137 = vmatprep.subr.bf16.mxu1 %v1606_v37  ;;  %v387_v4 = vld [vmem:[#allocation2 + $0x228] sm:$0xff]  ;;  %v1636_v7 = vcombine.high %v382_v1, %v386_v2  ;;  %v390_v9 = vld [vmem:[#allocation2 + $0x240] sm:$0xff]  ;;  %v1635_v13 = vcombine.low %v382_v1, %v386_v2  ;;  %v320_v2 = vld [vmem:[#allocation2 + $0x10] sm:$0xff] }
  0xa4   : > { %1118 = vmatprep.mubr.bf16.mxu0 %v2211_v58  ;;  %1161 = vmatprep.mubr.bf16.mxu1 %v2211_v58  ;;  %v1638_v8 = vcombine.high %v383_v3, %v387_v4  ;;  %v394_v10 = vld [vmem:[#allocation2 + $0x260] sm:$0xff]  ;;  %v391_v11 = vld [vmem:[#allocation2 + $0x248] sm:$0xff]  ;;  %v1637_v14 = vcombine.low %v383_v3, %v387_v4  ;;  %v324_v3 = vld [vmem:[#allocation2 + $0x30] sm:$0xff] }
  0xa5   : > { %v395_v12 = vld [vmem:[#allocation2 + $0x268] sm:$0xff]  ;;  %v1644_v15 = vcombine.high %v390_v9, %v394_v10  ;;  %v398_v17 = vld [vmem:[#allocation2 + $0x280] sm:$0xff]  ;;  %v1643_v21 = vcombine.low %v390_v9, %v394_v10  ;;  %v321_v4 = vld [vmem:[#allocation2 + $0x18] sm:$0xff]  ;;  %v1576_v10 = vcombine.high %v320_v2, %v324_v3 }
  0xa6   : > { %1095 = vmatpush1.bf16.msra.mxu0 %v1603_v42  ;;  %1138 = vmatpush1.bf16.msra.mxu1 %v1605_v43  ;;  %v1646_v16 = vcombine.high %v391_v11, %v395_v12  ;;  %v402_v18 = vld [vmem:[#allocation2 + $0x2a0] sm:$0xff]  ;;  %v399_v19 = vld [vmem:[#allocation2 + $0x288] sm:$0xff]  ;;  %v1645_v22 = vcombine.low %v391_v11, %v395_v12  ;;  %v328_v12 = vld [vmem:[#allocation2 + $0x50] sm:$0xff] }
  0xa7   : > { %1096 = vmatprep.subr.bf16.mxu0 %v1612_v44  ;;  %1139 = vmatprep.subr.bf16.mxu1 %v1614_v45  ;;  %v403_v20 = vld [vmem:[#allocation2 + $0x2a8] sm:$0xff]  ;;  %v1652_v23 = vcombine.high %v398_v17, %v402_v18  ;;  %v406_v25 = vld [vmem:[#allocation2 + $0x2c0] sm:$0xff]  ;;  %v1651_v29 = vcombine.low %v398_v17, %v402_v18  ;;  %v1575_v17 = vcombine.low %v320_v2, %v324_v3 }
  0xa8   : > { %v1654_v24 = vcombine.high %v399_v19, %v403_v20  ;;  %v410_v26 = vld [vmem:[#allocation2 + $0x2e0] sm:$0xff]  ;;  %v407_v27 = vld [vmem:[#allocation2 + $0x2c8] sm:$0xff]  ;;  %v1653_v30 = vcombine.low %v399_v19, %v403_v20 }
  0xa9   : > { %v411_v28 = vld [vmem:[#allocation2 + $0x2e8] sm:$0xff]  ;;  %v1660_v31 = vcombine.high %v406_v25, %v410_v26  ;;  %v414_v33 = vld [vmem:[#allocation2 + $0x300] sm:$0xff]  ;;  %v1659_v37 = vcombine.low %v406_v25, %v410_v26 }
  0xaa   : > { %1097 = vmatpush1.bf16.msra.mxu0 %v1611_v50  ;;  %1140 = vmatpush1.bf16.msra.mxu1 %v1613_v51  ;;  %v1662_v32 = vcombine.high %v407_v27, %v411_v28  ;;  %v418_v34 = vld [vmem:[#allocation2 + $0x320] sm:$0xff]  ;;  %v415_v35 = vld [vmem:[#allocation2 + $0x308] sm:$0xff]  ;;  %v1661_v38 = vcombine.low %v407_v27, %v411_v28 }
  0xab   : > { %1098 = vmatprep.subr.bf16.mxu0 %v1620_v52  ;;  %1141 = vmatprep.subr.bf16.mxu1 %v1622_v55  ;;  %v419_v36 = vld [vmem:[#allocation2 + $0x328] sm:$0xff]  ;;  %v1668_v39 = vcombine.high %v414_v33, %v418_v34  ;;  %v422_v41 = vld [vmem:[#allocation2 + $0x340] sm:$0xff]  ;;  %v1667_v45 = vcombine.low %v414_v33, %v418_v34 }
  0xac   : > { %v1670_v40 = vcombine.high %v415_v35, %v419_v36  ;;  %v426_v42 = vld [vmem:[#allocation2 + $0x360] sm:$0xff]  ;;  %v423_v43 = vld [vmem:[#allocation2 + $0x348] sm:$0xff]  ;;  %v1669_v46 = vcombine.low %v415_v35, %v419_v36 }
  0xad   : > { %v427_v44 = vld [vmem:[#allocation2 + $0x368] sm:$0xff]  ;;  %v1676_v47 = vcombine.high %v422_v41, %v426_v42  ;;  %v430_v49 = vld [vmem:[#allocation2 + $0x380] sm:$0xff]  ;;  %v1675_v53 = vcombine.low %v422_v41, %v426_v42 }
  0xae   : > { %1099 = vmatpush1.bf16.msra.mxu0 %v1619_v61  ;;  %1142 = vmatpush1.bf16.msra.mxu1 %v1621_v62  ;;  %v1678_v48 = vcombine.high %v423_v43, %v427_v44  ;;  %v434_v50 = vld [vmem:[#allocation2 + $0x3a0] sm:$0xff]  ;;  %v431_v51 = vld [vmem:[#allocation2 + $0x388] sm:$0xff]  ;;  %v1677_v54 = vcombine.low %v423_v43, %v427_v44  ;;  %v360_v44 = vld [vmem:[#allocation2 + $0x150] sm:$0xff] }
  0xaf   : > { %1100 = vmatprep.subr.bf16.mxu0 %v1628_v63  ;;  %1143 = vmatprep.subr.bf16.mxu1 %v1630_v0  ;;  %v435_v52 = vld [vmem:[#allocation2 + $0x3a8] sm:$0xff]  ;;  %v1684_v55 = vcombine.high %v430_v49, %v434_v50  ;;  %v438_v57 = vld [vmem:[#allocation2 + $0x3c0] sm:$0xff]  ;;  %v1683_v62 = vcombine.low %v430_v49, %v434_v50 }
  0xb0   : > { %v1686_v56 = vcombine.high %v431_v51, %v435_v52  ;;  %v442_v59 = vld [vmem:[#allocation2 + $0x3e0] sm:$0xff]  ;;  %v439_v60 = vld [vmem:[#allocation2 + $0x3c8] sm:$0xff]  ;;  %v1685_v63 = vcombine.low %v431_v51, %v435_v52  ;;  %v368_v52 = vld [vmem:[#allocation2 + $0x190] sm:$0xff] }
  0xb1   : > { %v443_v61 = vld [vmem:[#allocation2 + $0x3e8] sm:$0xff]  ;;  %v1692_v0 = vcombine.high %v438_v57, %v442_v59 }
  0xb2   : > { %1101 = vmatpush1.bf16.msra.mxu0 %v1627_v5  ;;  %1144 = vmatpush1.bf16.msra.mxu1 %v1629_v6  ;;  %v1694_v1 = vcombine.high %v439_v60, %v443_v61  ;;  %v325_v5 = vld [vmem:[#allocation2 + $0x38] sm:$0xff]  ;;  %v1691_v6 = vcombine.low %v438_v57, %v442_v59  ;;  %v1693_v9 = vcombine.low %v439_v60, %v443_v61  ;;  %v376_v61 = vld [vmem:[#allocation2 + $0x1d0] sm:$0xff] }
  0xb3   : > { %1102 = vmatprep.subr.bf16.mxu0 %v1636_v7  ;;  %1145 = vmatprep.subr.bf16.mxu1 %v1638_v8  ;;  %v312_v7 = vld [vmem:[%s2203_s22] sm:$0xff]  ;;  %v314_v8 = vld [vmem:[%s2203_s22 + $0x10] sm:$0xff]  ;;  %v1578_v11 = vcombine.high %v321_v4, %v325_v5  ;;  %v1577_v18 = vcombine.low %v321_v4, %v325_v5 }
  0xb4   : > { %v384_v5 = vld [vmem:[#allocation2 + $0x210] sm:$0xff] }
  0xb6   : > { %1103 = vmatpush1.bf16.msra.mxu0 %v1635_v13  ;;  %1146 = vmatpush1.bf16.msra.mxu1 %v1637_v14  ;;  %v332_v13 = vld [vmem:[#allocation2 + $0x70] sm:$0xff]  ;;  %v2217_v14 = vpack.c.bf16 %v314_v8, %v312_v7  ;;  %v385_v7 = vld [vmem:[#allocation2 + $0x218] sm:$0xff] }
  0xb7   : > { %1104 = vmatprep.subr.bf16.mxu0 %v1644_v15  ;;  %1147 = vmatprep.subr.bf16.mxu1 %v1646_v16  ;;  %v329_v15 = vld [vmem:[#allocation2 + $0x58] sm:$0xff]  ;;  %v1584_v19 = vcombine.high %v328_v12, %v332_v13  ;;  %v1583_v25 = vcombine.low %v328_v12, %v332_v13  ;;  %v392_v13 = vld [vmem:[#allocation2 + $0x250] sm:$0xff] }
  0xb8   : > { %v333_v16 = vld [vmem:[#allocation2 + $0x78] sm:$0xff] }
  0xb9   : > { %v1586_v20 = vcombine.high %v329_v15, %v333_v16  ;;  %v1585_v26 = vcombine.low %v329_v15, %v333_v16  ;;  %v389_v8 = vld [vmem:[#allocation2 + $0x238] sm:$0xff]  ;;  %v396_v15 = vld [vmem:[#allocation2 + $0x270] sm:$0xff] }
  0xba   : > { %1105 = vmatpush1.bf16.msra.mxu0 %v1643_v21  ;;  %1148 = vmatpush1.bf16.msra.mxu1 %v1645_v22  ;;  %v336_v21 = vld [vmem:[#allocation2 + $0x90] sm:$0xff]  ;;  %v1642_v12 = vcombine.high %v385_v7, %v389_v8  ;;  %v393_v16 = vld [vmem:[#allocation2 + $0x258] sm:$0xff] }
  0xbb   : > { %1106 = vmatprep.subr.bf16.mxu0 %v1652_v23  ;;  %1149 = vmatprep.subr.bf16.mxu1 %v1654_v24  ;;  %v340_v22 = vld [vmem:[#allocation2 + $0xb0] sm:$0xff]  ;;  %v337_v23 = vld [vmem:[#allocation2 + $0x98] sm:$0xff] }
  0xbc   : > { %v341_v24 = vld [vmem:[#allocation2 + $0xb8] sm:$0xff]  ;;  %v1592_v27 = vcombine.high %v336_v21, %v340_v22  ;;  %v1591_v33 = vcombine.low %v336_v21, %v340_v22  ;;  %v400_v22 = vld [vmem:[#allocation2 + $0x290] sm:$0xff] }
  0xbd   : > { %v1594_v28 = vcombine.high %v337_v23, %v341_v24  ;;  %v1593_v34 = vcombine.low %v337_v23, %v341_v24  ;;  %v404_v23 = vld [vmem:[#allocation2 + $0x2b0] sm:$0xff]  ;;  %v401_v24 = vld [vmem:[#allocation2 + $0x298] sm:$0xff] }
  0xbe   : > { %1107 = vmatpush1.bf16.msra.mxu0 %v1651_v29  ;;  %1150 = vmatpush1.bf16.msra.mxu1 %v1653_v30  ;;  %v344_v29 = vld [vmem:[#allocation2 + $0xd0] sm:$0xff] }
  0xbf   : > { %1108 = vmatprep.subr.bf16.mxu0 %v1660_v31  ;;  %1151 = vmatprep.subr.bf16.mxu1 %v1662_v32  ;;  %v348_v30 = vld [vmem:[#allocation2 + $0xf0] sm:$0xff]  ;;  %v345_v31 = vld [vmem:[#allocation2 + $0xd8] sm:$0xff] }
  0xc0   : > { %v349_v32 = vld [vmem:[#allocation2 + $0xf8] sm:$0xff]  ;;  %v1600_v35 = vcombine.high %v344_v29, %v348_v30  ;;  %v1599_v41 = vcombine.low %v344_v29, %v348_v30  ;;  %v408_v30 = vld [vmem:[#allocation2 + $0x2d0] sm:$0xff] }
  0xc1   : > { %v1602_v36 = vcombine.high %v345_v31, %v349_v32  ;;  %v1601_v42 = vcombine.low %v345_v31, %v349_v32  ;;  %v412_v31 = vld [vmem:[#allocation2 + $0x2f0] sm:$0xff]  ;;  %v409_v32 = vld [vmem:[#allocation2 + $0x2d8] sm:$0xff] }
  0xc2   : > { %1109 = vmatpush1.bf16.msra.mxu0 %v1659_v37  ;;  %1152 = vmatpush1.bf16.msra.mxu1 %v1661_v38  ;;  %v352_v37 = vld [vmem:[#allocation2 + $0x110] sm:$0xff] }
  0xc3   : > { %1110 = vmatprep.subr.bf16.mxu0 %v1668_v39  ;;  %1153 = vmatprep.subr.bf16.mxu1 %v1670_v40  ;;  %v356_v38 = vld [vmem:[#allocation2 + $0x130] sm:$0xff]  ;;  %v353_v39 = vld [vmem:[#allocation2 + $0x118] sm:$0xff] }
  0xc4   : > { %v357_v40 = vld [vmem:[#allocation2 + $0x138] sm:$0xff]  ;;  %v1608_v43 = vcombine.high %v352_v37, %v356_v38 }
  0xc5   : > { %v1609_v49 = vcombine.low %v353_v39, %v357_v40 }
  0xc6   : > { %1111 = vmatpush1.bf16.msra.mxu0 %v1667_v45  ;;  %1154 = vmatpush1.bf16.msra.mxu1 %v1669_v46  ;;  %v364_v45 = vld [vmem:[#allocation2 + $0x170] sm:$0xff]  ;;  %v361_v46 = vld [vmem:[#allocation2 + $0x158] sm:$0xff] }
  0xc7   : > { %1112 = vmatprep.subr.bf16.mxu0 %v1676_v47  ;;  %1155 = vmatprep.subr.bf16.mxu1 %v1678_v48  ;;  %v365_v47 = vld [vmem:[#allocation2 + $0x178] sm:$0xff]  ;;  %v1607_v48 = vcombine.low %v352_v37, %v356_v38  ;;  %v1616_v50 = vcombine.high %v360_v44, %v364_v45  ;;  %v416_v38 = vld [vmem:[#allocation2 + $0x310] sm:$0xff] }
  0xc8   : > { %v1618_v51 = vcombine.high %v361_v46, %v365_v47  ;;  %v1617_v57 = vcombine.low %v361_v46, %v365_v47  ;;  %v428_v46 = vld [vmem:[#allocation2 + $0x370] sm:$0xff]  ;;  %v425_v47 = vld [vmem:[#allocation2 + $0x358] sm:$0xff] }
  0xca   : > { %1113 = vmatpush1.bf16.msra.mxu0 %v1675_v53  ;;  %1156 = vmatpush1.bf16.msra.mxu1 %v1677_v54  ;;  %v372_v53 = vld [vmem:[#allocation2 + $0x1b0] sm:$0xff]  ;;  %v369_v54 = vld [vmem:[#allocation2 + $0x198] sm:$0xff] }
  0xcb   : > { %1114 = vmatprep.subr.bf16.mxu0 %v1684_v55  ;;  %1157 = vmatprep.subr.bf16.mxu1 %v1686_v56  ;;  %v373_v55 = vld [vmem:[#allocation2 + $0x1b8] sm:$0xff]  ;;  %v1615_v56 = vcombine.low %v360_v44, %v364_v45  ;;  %v1624_v59 = vcombine.high %v368_v52, %v372_v53  ;;  %v424_v45 = vld [vmem:[#allocation2 + $0x350] sm:$0xff] }
  0xcc   : > { %v1626_v60 = vcombine.high %v369_v54, %v373_v55  ;;  %v1625_v2 = vcombine.low %v369_v54, %v373_v55  ;;  %v436_v54 = vld [vmem:[#allocation2 + $0x3b0] sm:$0xff]  ;;  %v433_v55 = vld [vmem:[#allocation2 + $0x398] sm:$0xff] }
  0xce   : > { %1115 = vmatpush1.bf16.msra.mxu0 %v1683_v62  ;;  %1158 = vmatpush1.bf16.msra.mxu1 %v1685_v63  ;;  %v380_v62 = vld [vmem:[#allocation2 + $0x1f0] sm:$0xff]  ;;  %v377_v63 = vld [vmem:[#allocation2 + $0x1d8] sm:$0xff] }
  0xcf   : > { %1116 = vmatprep.subr.bf16.mxu0 %v1692_v0  ;;  %1159 = vmatprep.subr.bf16.mxu1 %v1694_v1  ;;  %v381_v0 = vld [vmem:[#allocation2 + $0x1f8] sm:$0xff]  ;;  %v1623_v1 = vcombine.low %v368_v52, %v372_v53  ;;  %v1632_v3 = vcombine.high %v376_v61, %v380_v62  ;;  %v432_v53 = vld [vmem:[#allocation2 + $0x390] sm:$0xff] }
  0xd0   : > { %v1634_v4 = vcombine.high %v377_v63, %v381_v0 }
  0xd2   : > { %1117 = vmatpush1.bf16.msra.mxu0 %v1691_v6  ;;  %1160 = vmatpush1.bf16.msra.mxu1 %v1693_v9  ;;  %v388_v6 = vld [vmem:[#allocation2 + $0x230] sm:$0xff]  ;;  %v1631_v9 = vcombine.low %v376_v61, %v380_v62 }
  0xd3   : > { %1172 = vmatprep.subr.bf16.mxu0 %v1576_v10  ;;  %1215 = vmatprep.subr.bf16.mxu1 %v1578_v11  ;;  %v1633_v10 = vcombine.low %v377_v63, %v381_v0  ;;  %v1640_v11 = vcombine.high %v384_v5, %v388_v6  ;;  %v440_v62 = vld [vmem:[#allocation2 + $0x3d0] sm:$0xff]  ;;  %v441_v0 = vld [vmem:[#allocation2 + $0x3d8] sm:$0xff] }
  0xd4   : > { %v444_v63 = vld [vmem:[#allocation2 + $0x3f0] sm:$0xff] }
  0xd5   : > { %1119 = vmatmul.mubr.bf16.vlgmr.msra.gmra.mrb[0].mxu0 %v2217_v14  ;;  %1162 = vmatmul.mubr.bf16.vlgmr.msra.gmra.mrb[0].mxu1 %v2217_v14 }
  0xd6   : > { %1173 = vmatpush1.bf16.msra.mxu0 %v1575_v17  ;;  %1216 = vmatpush1.bf16.msra.mxu1 %v1577_v18  ;;  %v397_v17 = vld [vmem:[#allocation2 + $0x278] sm:$0xff]  ;;  %v1639_v18 = vcombine.low %v384_v5, %v388_v6  ;;  %v1695_v6 = vcombine.low %v440_v62, %v444_v63 }
  0xd7   : > { %1174 = vmatprep.subr.bf16.mxu0 %v1584_v19  ;;  %1217 = vmatprep.subr.bf16.mxu1 %v1586_v20  ;;  %v1641_v19 = vcombine.low %v385_v7, %v389_v8  ;;  %v1648_v20 = vcombine.high %v392_v13, %v396_v15  ;;  %v1650_v21 = vcombine.high %v393_v16, %v397_v17  ;;  %v1276_v8 = vlaneseq }
  0xd8   : > { %1204 = vmatprep.mubr.bf16.mxu0 %v2211_v58  ;;  %1247 = vmatprep.mubr.bf16.mxu1 %v2211_v58  ;;  %v1610_v58 = vcombine.high %v353_v39, %v357_v40  ;;  %v420_v39 = vld [vmem:[#allocation2 + $0x330] sm:$0xff]  ;;  %v417_v40 = vld [vmem:[#allocation2 + $0x318] sm:$0xff] }
  0xda   : > { %1175 = vmatpush1.bf16.msra.mxu0 %v1583_v25  ;;  %1218 = vmatpush1.bf16.msra.mxu1 %v1585_v26  ;;  %v405_v25 = vld [vmem:[#allocation2 + $0x2b8] sm:$0xff]  ;;  %v1647_v26 = vcombine.low %v392_v13, %v396_v15 }
  0xdb   : > { %1176 = vmatprep.subr.bf16.mxu0 %v1592_v27  ;;  %1219 = vmatprep.subr.bf16.mxu1 %v1594_v28  ;;  %v1649_v27 = vcombine.low %v393_v16, %v397_v17  ;;  %v1656_v28 = vcombine.high %v400_v22, %v404_v23  ;;  %v1658_v29 = vcombine.high %v401_v24, %v405_v25  ;;  %v1287_v16 = vld [vmem:[%s2229_s7 + $0x40] sm:$0xff]  ;;  %v1282_v17 = vld [vmem:[%s2229_s7 + $0x18] sm:$0xff] }
  0xde   : > { %1177 = vmatpush1.bf16.msra.mxu0 %v1591_v33  ;;  %1220 = vmatpush1.bf16.msra.mxu1 %v1593_v34  ;;  %v413_v33 = vld [vmem:[#allocation2 + $0x2f8] sm:$0xff]  ;;  %v1655_v34 = vcombine.low %v400_v22, %v404_v23  ;;  %v1289_v22 = vld [vmem:[%s2229_s7 + $0x50] sm:$0xff] }
  0xdf   : > { %1178 = vmatprep.subr.bf16.mxu0 %v1600_v35  ;;  %1221 = vmatprep.subr.bf16.mxu1 %v1602_v36  ;;  %v1657_v35 = vcombine.low %v401_v24, %v405_v25  ;;  %v1664_v36 = vcombine.high %v408_v30, %v412_v31  ;;  %v1666_v37 = vcombine.high %v409_v32, %v413_v33 }
  0xe2   : > { %1179 = vmatpush1.bf16.msra.mxu0 %v1599_v41  ;;  %1222 = vmatpush1.bf16.msra.mxu1 %v1601_v42  ;;  %v421_v41 = vld [vmem:[#allocation2 + $0x338] sm:$0xff]  ;;  %v1663_v42 = vcombine.low %v408_v30, %v412_v31 }
  0xe3   : > { %1180 = vmatprep.subr.bf16.mxu0 %v1608_v43  ;;  %1223 = vmatprep.subr.bf16.mxu1 %v1610_v58  ;;  %v1665_v43 = vcombine.low %v409_v32, %v413_v33  ;;  %v1672_v58 = vcombine.high %v416_v38, %v420_v39  ;;  %v1674_v44 = vcombine.high %v417_v40, %v421_v41 }
  0xe6   : > { %1181 = vmatpush1.bf16.msra.mxu0 %v1607_v48  ;;  %1224 = vmatpush1.bf16.msra.mxu1 %v1609_v49  ;;  %v429_v48 = vld [vmem:[#allocation2 + $0x378] sm:$0xff]  ;;  %v1671_v49 = vcombine.low %v416_v38, %v420_v39 }
  0xe7   : > { %1182 = vmatprep.subr.bf16.mxu0 %v1616_v50  ;;  %1225 = vmatprep.subr.bf16.mxu1 %v1618_v51  ;;  %v1673_v50 = vcombine.low %v417_v40, %v421_v41  ;;  %v1680_v51 = vcombine.high %v424_v45, %v428_v46  ;;  %v1682_v52 = vcombine.high %v425_v47, %v429_v48 }
  0xea   : > { %1183 = vmatpush1.bf16.msra.mxu0 %v1615_v56  ;;  %1226 = vmatpush1.bf16.msra.mxu1 %v1617_v57  ;;  %v437_v56 = vld [vmem:[#allocation2 + $0x3b8] sm:$0xff]  ;;  %v1679_v57 = vcombine.low %v424_v45, %v428_v46 }
  0xeb   : > { %1184 = vmatprep.subr.bf16.mxu0 %v1624_v59  ;;  %1227 = vmatprep.subr.bf16.mxu1 %v1626_v60  ;;  %v1681_v59 = vcombine.low %v425_v47, %v429_v48  ;;  %v1688_v60 = vcombine.high %v432_v53, %v436_v54  ;;  %v1690_v61 = vcombine.high %v433_v55, %v437_v56 }
  0xee   : > { %1185 = vmatpush1.bf16.msra.mxu0 %v1623_v1  ;;  %1228 = vmatpush1.bf16.msra.mxu1 %v1625_v2  ;;  %v445_v1 = vld [vmem:[#allocation2 + $0x3f8] sm:$0xff]  ;;  %v1687_v2 = vcombine.low %v432_v53, %v436_v54 }
  0xef   : > { %1186 = vmatprep.subr.bf16.mxu0 %v1632_v3  ;;  %1229 = vmatprep.subr.bf16.mxu1 %v1634_v4  ;;  %v1689_v3 = vcombine.low %v433_v55, %v437_v56  ;;  %v1696_v4 = vcombine.high %v440_v62, %v444_v63  ;;  %v1698_v5 = vcombine.high %v441_v0, %v445_v1  ;;  %v1285_v62 = vld [vmem:[%s2229_s7 + $0x30] sm:$0xff] }
  0xf0   : > { %v1697_v7 = vcombine.low %v441_v0, %v445_v1  ;;  %v1291_v0 = vld [vmem:[%s2229_s7 + $0x60] sm:$0xff]  ;;  %v1286_v1 = vld [vmem:[%s2229_s7 + $0x38] sm:$0xff] }
  0xf2   : > { %1187 = vmatpush1.bf16.msra.mxu0 %v1631_v9  ;;  %1230 = vmatpush1.bf16.msra.mxu1 %v1633_v10  ;;  %v1277_v9 = vshrl.u32 %v1276_v8, 7  ;;  %v1279_v10 = vld [vmem:[%s2229_s7] sm:$0xff] }
  0xf3   : > { %1188 = vmatprep.subr.bf16.mxu0 %v1640_v11  ;;  %1231 = vmatprep.subr.bf16.mxu1 %v1642_v12  ;;  %v1327_v11 = vstv %s1275_s30  ;;  %v1280_v12 = vld [vmem:[%s2229_s7 + $0x8] sm:$0xff] }
  0xf4   : > { %v1278_v13 = vadd.s32 8, %v1277_v9  ;;  %vm2241_vm0 = vcmp.lt.s32.totalorder %v1277_v9, %v1327_v11 }
  0xf6   : > { %1189 = vmatpush1.bf16.msra.mxu0 %v1639_v18  ;;  %1232 = vmatpush1.bf16.msra.mxu1 %v1641_v19  ;;  %vm2249_vm1 = vcmp.lt.s32.totalorder %v1278_v13, %v1327_v11  ;;  %v1294_v11 = vld [vmem:[%s2229_s7 + $0x78] sm:$0xff] }
  0xf7   : > { %1190 = vmatprep.subr.bf16.mxu0 %v1648_v20  ;;  %1233 = vmatprep.subr.bf16.mxu1 %v1650_v21  ;;  %v1288_v21 = vld [vmem:[%s2229_s7 + $0x48] sm:$0xff] }
  0xfa   : > { %1191 = vmatpush1.bf16.msra.mxu0 %v1647_v26  ;;  %1234 = vmatpush1.bf16.msra.mxu1 %v1649_v27 }
  0xfb   : > { %1192 = vmatprep.subr.bf16.mxu0 %v1656_v28  ;;  %1235 = vmatprep.subr.bf16.mxu1 %v1658_v29  ;;  %v1290_v28 = vld [vmem:[%s2229_s7 + $0x58] sm:$0xff] }
  0xfe   : > { %1193 = vmatpush1.bf16.msra.mxu0 %v1655_v34  ;;  %1236 = vmatpush1.bf16.msra.mxu1 %v1657_v35 }
  0xff   : > { %1194 = vmatprep.subr.bf16.mxu0 %v1664_v36  ;;  %1237 = vmatprep.subr.bf16.mxu1 %v1666_v37 }
 0x102   : > { %1195 = vmatpush1.bf16.msra.mxu0 %v1663_v42  ;;  %1238 = vmatpush1.bf16.msra.mxu1 %v1665_v43 }
 0x103   : > { %1196 = vmatprep.subr.bf16.mxu0 %v1672_v58  ;;  %1239 = vmatprep.subr.bf16.mxu1 %v1674_v44 }
 0x106   : > { %1197 = vmatpush1.bf16.msra.mxu0 %v1671_v49  ;;  %1240 = vmatpush1.bf16.msra.mxu1 %v1673_v50 }
 0x107   : > { %1198 = vmatprep.subr.bf16.mxu0 %v1680_v51  ;;  %1241 = vmatprep.subr.bf16.mxu1 %v1682_v52 }
 0x10a   : > { %1199 = vmatpush1.bf16.msra.mxu0 %v1679_v57  ;;  %1242 = vmatpush1.bf16.msra.mxu1 %v1681_v59 }
 0x10b   : > { %1200 = vmatprep.subr.bf16.mxu0 %v1688_v60  ;;  %1243 = vmatprep.subr.bf16.mxu1 %v1690_v61  ;;  %v1283_v60 = vld [vmem:[%s2229_s7 + $0x20] sm:$0xff]  ;;  %v1284_v61 = vld [vmem:[%s2229_s7 + $0x28] sm:$0xff] }
 0x10e   : > { %1201 = vmatpush1.bf16.msra.mxu0 %v1687_v2  ;;  %1244 = vmatpush1.bf16.msra.mxu1 %v1689_v3 }
 0x10f   : > { %1202 = vmatprep.subr.bf16.mxu0 %v1696_v4  ;;  %1245 = vmatprep.subr.bf16.mxu1 %v1698_v5  ;;  %v1292_v5 = vld [vmem:[%s2229_s7 + $0x68] sm:$0xff] }
 0x112   : > { %1203 = vmatpush1.bf16.msra.mxu0 %v1695_v6  ;;  %1246 = vmatpush1.bf16.msra.mxu1 %v1697_v7  ;;  %v1293_v6 = vld [vmem:[%s2229_s7 + $0x70] sm:$0xff] }
 0x115   : > { %1205 = vmatmul.mubr.bf16.vlgmr.msra.gmra.mrb[4].mxu0 %v2217_v14  ;;  %1248 = vmatmul.mubr.bf16.vlgmr.msra.gmra.mrb[4].mxu1 %v2217_v14  ;;  %v1281_v14 = vld [vmem:[%s2229_s7 + $0x10] sm:$0xff] }
 0x1a8   : > { %v1120_v15 = vpop.f32.mrb[0].mxu0  ;;  %v1163_v20 = vpop.f32.mrb[0].mxu1 }
 0x1a9   : > { %1258 = vst [vmem:[%s2236_s5] sm:$0xff] %v1120_v15  ;;  %v1295_v18 = vsub.f32 %v1120_v15, %v1279_v10  ;;  %v1122_v19 = vpop.f32.mrb[1].mxu0  ;;  %1260 = vst [vmem:[%s2236_s5 + $0x10] sm:$0xff] %v1163_v20  ;;  %v1297_v26 = vsub.f32 %v1163_v20, %v1281_v14  ;;  %v1165_v27 = vpop.f32.mrb[1].mxu1 }
 0x1aa   : > { %1259 = vst [vmem:[%s2236_s5 + $0x8] sm:$0xff] %v1122_v19  ;;  %v1296_v24 = vsub.f32 %v1122_v19, %v1280_v12  ;;  %v1124_v25 = vpop.f32.mrb[2].mxu0  ;;  %1261 = vst [vmem:[%s2236_s5 + $0x18] sm:$0xff] %v1165_v27  ;;  %v1298_v33 = vsub.f32 %v1165_v27, %v1282_v17  ;;  %v1167_v34 = vpop.f32.mrb[2].mxu1 }
 0x1ab   : > { %v1311_v29 = vand.u32 2147483647, %v1295_v18  ;;  %1266 = vst [vmem:[%s2236_s5 + $0x40] sm:$0xff] %v1124_v25  ;;  %v1303_v30 = vsub.f32 %v1124_v25, %v1287_v16  ;;  %v1126_v32 = vpop.f32.mrb[3].mxu0  ;;  %v1313_v36 = vand.u32 2147483647, %v1297_v26  ;;  %v1305_v38 = vsub.f32 %v1167_v34, %v1289_v22 }
 0x1ac   : > { %v1312_v35 = vand.u32 2147483647, %v1296_v24  ;;  %1267 = vst [vmem:[%s2236_s5 + $0x48] sm:$0xff] %v1126_v32  ;;  %v1304_v37 = vsub.f32 %v1126_v32, %v1288_v21  ;;  %1268 = vst [vmem:[%s2236_s5 + $0x50] sm:$0xff] %v1167_v34  ;;  %v1169_v39 = vpop.f32.mrb[3].mxu1 }
 0x1ad   : > { %v1334_v40 = vsel %vm2241_vm0, %v1311_v29, 0.0  ;;  %v1319_v41 = vand.u32 2147483647, %v1303_v30  ;;  %v1314_v42 = vand.u32 2147483647, %v1298_v33  ;;  %1269 = vst [vmem:[%s2236_s5 + $0x58] sm:$0xff] %v1169_v39  ;;  %v1306_v43 = vsub.f32 %v1169_v39, %v1290_v28 }
 0x1ae   : > { %v1335_v58 = vsel %vm2241_vm0, %v1312_v35, 0.0  ;;  %v1336_v44 = vsel %vm2241_vm0, %v1313_v36, 0.0  ;;  %v1320_v45 = vand.u32 2147483647, %v1304_v37  ;;  %v1321_v46 = vand.u32 2147483647, %v1305_v38 }
 0x1af   : > { %v1350_v47 = vadd.f32 %v1335_v58, %v1334_v40  ;;  %v1342_v48 = vsel %vm2249_vm1, %v1319_v41, 0.0  ;;  %v1337_v50 = vsel %vm2241_vm0, %v1314_v42, 0.0  ;;  %v1322_v52 = vand.u32 2147483647, %v1306_v43 }
 0x1b0   : > { %v1343_v49 = vsel %vm2249_vm1, %v1320_v45, 0.0  ;;  %v1344_v51 = vsel %vm2249_vm1, %v1321_v46, 0.0 }
 0x1b1   : > { %v1352_v53 = vadd.f32 %v1350_v47, %v1336_v44  ;;  %v1351_v54 = vadd.f32 %v1343_v49, %v1342_v48  ;;  %v1345_v57 = vsel %vm2249_vm1, %v1322_v52, 0.0 }
 0x1b3   : > { %v1354_v55 = vadd.f32 %v1352_v53, %v1337_v50  ;;  %v1353_v56 = vadd.f32 %v1351_v54, %v1344_v51 }
 0x1b5   : > { %v1355_v59 = vadd.f32 %v1353_v56, %v1345_v57 }
 0x1e8   : > { %v1206_v63 = vpop.f32.mrb[4].mxu0  ;;  %v1249_v4 = vpop.f32.mrb[4].mxu1 }
 0x1e9   : > { %1262 = vst [vmem:[%s2236_s5 + $0x20] sm:$0xff] %v1206_v63  ;;  %v1299_v2 = vsub.f32 %v1206_v63, %v1283_v60  ;;  %v1208_v3 = vpop.f32.mrb[5].mxu0  ;;  %1264 = vst [vmem:[%s2236_s5 + $0x30] sm:$0xff] %v1249_v4  ;;  %v1301_v8 = vsub.f32 %v1249_v4, %v1285_v62  ;;  %v1251_v10 = vpop.f32.mrb[5].mxu1 }
 0x1ea   : > { %1263 = vst [vmem:[%s2236_s5 + $0x28] sm:$0xff] %v1208_v3  ;;  %v1300_v7 = vsub.f32 %v1208_v3, %v1284_v61  ;;  %v1210_v9 = vpop.f32.mrb[6].mxu0  ;;  %1265 = vst [vmem:[%s2236_s5 + $0x38] sm:$0xff] %v1251_v10  ;;  %v1302_v14 = vsub.f32 %v1251_v10, %v1286_v1  ;;  %v1253_v16 = vpop.f32.mrb[6].mxu1 }
 0x1eb   : > { %v1315_v12 = vand.u32 2147483647, %v1299_v2  ;;  %1270 = vst [vmem:[%s2236_s5 + $0x60] sm:$0xff] %v1210_v9  ;;  %v1307_v13 = vsub.f32 %v1210_v9, %v1291_v0  ;;  %v1212_v15 = vpop.f32.mrb[7].mxu0  ;;  %v1317_v18 = vand.u32 2147483647, %v1301_v8  ;;  %v1309_v20 = vsub.f32 %v1253_v16, %v1293_v6 }
 0x1ec   : > { %v1316_v17 = vand.u32 2147483647, %v1300_v7  ;;  %1271 = vst [vmem:[%s2236_s5 + $0x68] sm:$0xff] %v1212_v15  ;;  %v1308_v19 = vsub.f32 %v1212_v15, %v1292_v5  ;;  %1272 = vst [vmem:[%s2236_s5 + $0x70] sm:$0xff] %v1253_v16  ;;  %v1255_v21 = vpop.f32.mrb[7].mxu1 }
 0x1ed   : > { %v1338_v22 = vsel %vm2241_vm0, %v1315_v12, 0.0  ;;  %v1323_v24 = vand.u32 2147483647, %v1307_v13  ;;  %1273 = vst [vmem:[%s2236_s5 + $0x78] sm:$0xff] %v1255_v21  ;;  %v1310_v25 = vsub.f32 %v1255_v21, %v1294_v11  ;;  %v1340_v29 = vsel %vm2241_vm0, %v1317_v18, 0.0 }
 0x1ee   : > { %v1356_v26 = vadd.f32 %v1354_v55, %v1338_v22  ;;  %v1339_v27 = vsel %vm2241_vm0, %v1316_v17, 0.0  ;;  %v1324_v28 = vand.u32 2147483647, %v1308_v19  ;;  %v1318_v32 = vand.u32 2147483647, %v1302_v14 }
 0x1ef   : > { %v1346_v30 = vsel %vm2249_vm1, %v1323_v24, 0.0  ;;  %v1325_v33 = vand.u32 2147483647, %v1309_v20  ;;  %v1326_v37 = vand.u32 2147483647, %v1310_v25 }
 0x1f0   : > { %v1358_v34 = vadd.f32 %v1356_v26, %v1339_v27  ;;  %v1357_v35 = vadd.f32 %v1355_v59, %v1346_v30  ;;  %v1347_v36 = vsel %vm2249_vm1, %v1324_v28, 0.0  ;;  %v1341_v40 = vsel %vm2241_vm0, %v1318_v32, 0.0 }
 0x1f1   : > { %v1348_v41 = vsel %vm2249_vm1, %v1325_v33, 0.0  ;;  %v1349_v58 = vsel %vm2249_vm1, %v1326_v37, 0.0 }
 0x1f2   : > { %v1360_v38 = vadd.f32 %v1358_v34, %v1340_v29  ;;  %v1359_v39 = vadd.f32 %v1357_v35, %v1347_v36 }
 0x1f4   : > { %v1362_v42 = vadd.f32 %v1360_v38, %v1341_v40  ;;  %v1361_v43 = vadd.f32 %v1359_v39, %v1348_v41 }
 0x1f6   : > { %v1363_v44 = vadd.f32 %v1361_v43, %v1349_v58 }
 0x1f8   : > { %v1364_v45 = vadd.f32 %v1363_v44, %v1362_v42 }
 0x1fa   : > { %v1365_v46 = vrot.slane %v1364_v45, 4 }
 0x1fc   : > { %v1366_v47 = vadd.f32 %v1365_v46, %v1364_v45 }
 0x1fe   : > { %v1367_v48 = vrot.slane %v1366_v47, 2 }
 0x200   : > { %v1368_v49 = vadd.f32 %v1367_v48, %v1366_v47  ;;  %1383 = sbr.rel (!%p2425_p12) target bundleno = 547 (0x223), region = 48 }
 0x202   : > { %v1369_v50 = vrot.slane %v1368_v49, 1 }
 0x204   : > { %v1370_v51 = vadd.f32 %v1369_v50, %v1368_v49 }
 0x206   : > { %1371 = vst [vmem:[%s293_s13] sm:$0x1] %v1370_v51 }
 0x207   : > { %s2437_s12 = smov (!%p1386_p2, %s1385_s12), 2 }
 0x208   : > { %s2313_s23 = sshll.u32 %s2437_s12, 10 }
 0x209   : > { %s1391_s8 = ssub.s32 2048, %s2313_s23 }
 0x20a   : > { %1392 = vsyncadd %s1373_s20, %s1391_s8  ;;  %p1704_p3 = scmp.ne.s32.totalorder %s2313_s23, 0  ;;  %s1720_s9 = sshll.u32 %s2032_s19, 11 }
 0x20b   : > { %s2323_s22 = scalar_lea.hbm %s2403_s3, %s1720_s9  ;;  %s1398_s26 = sshll.u32 %s2236_s5, 4  ;;  %s2326_s26 = int_to_ptr.vmem [resolvable:$true] %s1398_s26 }
 0x20c   : > { %s1869_s30 = scalar_lea.vmem %s2326_s26, %s2313_s23  ;;  %s1982_s7 = smov [#allocation8]  }
 0x20d   : > { %p1870_p13 = scmp.ne.s32.totalorder %s2326_s26, %s1869_s30  ;;  %s1873_s25 = sshll.u32 %s1982_s7, 4  ;;  %s1874_s25 = int_to_ptr.vmem [resolvable:$false] %s1873_s25 }
 0x20e   : > { %s1875_s12 = scalar_lea.vmem %s1874_s25, 4096  ;;  %p1876_p9 = scmp.lt.s32.totalorder %s2326_s26, %s1874_s25 }
 0x20f   : > { %p1871_p7 = pnand %p1870_p13, %p1704_p3  ;;  %p1877_p1 = scmp.lt.s32.totalorder %s1875_s12, %s1869_s30 }
 0x211   : > { %p1872_p8 = pneg %p1871_p7  ;;  %p1878_p4 = por %p1877_p1, %p1876_p9 }
 0x213   : > { %p1879_p10 = pnand %p1878_p4, %p1872_p8 }
 0x215   : > { %1882 = shalt.err (!%p1879_p10)
}
 0x216   : > { %s1883_s5 = scalar_lea.hbm %s2323_s22, %s2313_s23  ;;  %s1887_s6 = scalar_lea.hbm %s2403_s3, 3072 }
 0x217   : > { %p1884_p5 = scmp.ne.s32.totalorder %s2323_s22, %s1883_s5  ;;  %p1888_p12 = scmp.lt.u32.totalorder %s2323_s22, %s2403_s3 }
 0x218   : > { %p1889_p2 = scmp.lt.u32.totalorder %s1887_s6, %s1883_s5  ;;  %p1891_p7 = scmp.lt.u32.totalorder %s1883_s5, %s2323_s22 }
 0x219   : > { %p1885_p11 = pnand %p1884_p5, %p1704_p3 }
 0x21a   : > { %p1890_p13 = por %p1889_p2, %p1888_p12 }
 0x21b   : > { %p1886_p6 = pneg %p1885_p11 }
 0x21c   : > { %p1892_p8 = por %p1891_p7, %p1890_p13 }
 0x21e   : > { %p1893_p9 = pnand %p1892_p8, %p1886_p6 }
 0x220   : > { %1896 = shalt.err (!%p1893_p9)
}
 0x221   : > { %s1983_s7 = smov 1024   ;;  %s1984_s25 = smov 64  }
 0x222   : > { %1404 = dma.vmem_to_hbm [thread:$0]  (%p1704_p3), %s2326_s26, %s2313_s23, %s2323_s22, %s1373_s20, %s1983_s7, %s1983_s7, %s1984_s25  }
 0x223 PF: > { %s2359_s5 = scalar_lea.hbm %s2404_s4, %s1699_s29  ;;  %s1414_s9 = sshll.u32 %s293_s13, 4  ;;  %s1415_s9 = int_to_ptr.vmem [resolvable:$true] %s1414_s9 }
 0x224   : > { %s1897_s6 = scalar_lea.vmem %s1415_s9, 16  ;;  %p2426_p4 = scmp.ne.s32.totalorder %s2411_s27, 0 }
 0x225   : > { %p1898_p1 = scmp.ne.s32.totalorder %s1415_s9, %s1897_s6  ;;  %s1985_s14 = smov [#allocation9]  }
 0x226   : > { %s1901_s20 = sshll.u32 %s1985_s14, 4  ;;  %s1902_s20 = int_to_ptr.vmem [resolvable:$false] %s1901_s20 }
 0x227   : > { %p1899_p10 = pnand %p1898_p1, %p2426_p4  ;;  %s1903_s23 = scalar_lea.vmem %s1902_s20, 32 }
 0x228   : > { %p1904_p3 = scmp.lt.s32.totalorder %s1415_s9, %s1902_s20  ;;  %p1905_p11 = scmp.lt.s32.totalorder %s1903_s23, %s1897_s6 }
 0x229   : > { %p1900_p5 = pneg %p1899_p10 }
 0x22a   : > { %p1906_p6 = por %p1905_p11, %p1904_p3 }
 0x22c   : > { %p1907_p12 = pnand %p1906_p6, %p1900_p5 }
 0x22e   : > { %1910 = shalt.err (!%p1907_p12)
}
 0x22f   : > { %s1911_s19 = scalar_lea.hbm %s2359_s5, 16  ;;  %s1915_s22 = scalar_lea.hbm %s2404_s4, 32 }
 0x230   : > { %p1912_p2 = scmp.ne.s32.totalorder %s2359_s5, %s1911_s19  ;;  %p1916_p8 = scmp.lt.u32.totalorder %s2359_s5, %s2404_s4 }
 0x231   : > { %p1917_p9 = scmp.lt.u32.totalorder %s1915_s22, %s1911_s19  ;;  %p1919_p10 = scmp.lt.u32.totalorder %s1911_s19, %s2359_s5 }
 0x232   : > { %p1913_p13 = pnand %p1912_p2, %p2426_p4 }
 0x233   : > { %p1918_p1 = por %p1917_p9, %p1916_p8 }
 0x234   : > { %p1914_p7 = pneg %p1913_p13 }
 0x235   : > { %p1920_p5 = por %p1919_p10, %p1918_p1 }
 0x237   : > { %p1921_p3 = pnand %p1920_p5, %p1914_p7 }
 0x239   : > { %1924 = shalt.err (!%p1921_p3)
}
 0x23a   : > { %1727 = dma.vmem_to_hbm [thread:$0]  (%p2426_p4), %s1415_s9, 16, %s2359_s5, %s1378_s11  }
 0x23b PF: > { %s1426_s7 = sand.u32 1, %s1959_s15   ;;  %p2427_p11 = scmp.ne.s32.totalorder %s2412_s28, 0 }
 0x23c   : > { %s1427_s25 = scalar_lea.sflag [#allocation4], %s1426_s7 }
 0x23d   : > { %p1735_p6 = pnand %p1547_p0, %p2427_p11 }
 0x23f   : > { %1950 = dma.done.wait (!%p1735_p6), %s1427_s25, 2048  }
 0x240   : > { %1952 = vsyncadd (!%p1735_p6), %s1427_s25, 4294965248  ;;  %s1436_s12 = scalar_lea.sflag [#allocation10], %s1426_s7 }
 0x241   : > { %1954 = dma.done.wait (!%p1735_p6), %s1436_s12, 16  }
 0x242   : > { %1956 = vsyncadd (!%p1735_p6), %s1436_s12, 4294967280  ;;  %p22_p4 = scmp.ge.s32.totalorder %s2036_s21, 4   ;;  %s2428_s15 = smov %s1963_s16 }
 0x243   : > { %s2429_s16 = smov %s1967_s17  ;;  %s2430_s17 = smov %s2048_s24 }
 0x244   : > { %s2431_s18 = smov %s2036_s21  ;;  %24 = sbr.rel (!%p22_p4) target bundleno = 8 (0x8), region = 110 }
 0x24b   :  { %1440 = vsyncpa [#allocation3], 1 }
 0x24c   :  { %1442 = vsyncpa [#allocation3 + $0x1], 1 }
 0x24d   :  { %1443 = vsyncpa [#allocation6], 1 }
 0x24e   :  { %1445 = vsyncpa [#allocation6 + $0x1], 1 }
 0x24f   :  { %1446 = vsyncpa [#allocation4], 1 }
 0x250   :  { %1448 = vsyncpa [#allocation4 + $0x1], 1 }
 0x251   :  { %1449 = vsyncpa [#allocation10], 1 }
 0x252   :  { %1451 = vsyncpa [#allocation10 + $0x1], 1 }

</bundles_post_ra>
